<compile_context>
chip_gen: v7x
topology: tpu7x:2x2x1
jax: 0.10.0
libtpu: 0.0.40
codegen_flags: <defaults>
</compile_context>

<pallas_src>
import jax
import jax.numpy as jnp
from jax.experimental import pallas as pl
from jax.experimental.pallas import tpu as pltpu

ALPHA = 0.25
GAMMA = 2.0  # hard-coded: explicit square in the kernel

LANES = 128
SUBLANES = 8
ROW_ALIGN = 32            # multiple-of-32 sublanes keeps bf16/int8 tiles dense
MIN_GRID = 8              # aim for >= 8 grid steps (v7x dual-TC + pipelining)
TARGET_BLOCK_ROWS = 8192  # 8192 x 128 x 4 B = 4 MiB per f32 input buffer


def _round_up(x: int, m: int) -> int:
    return ((x + m - 1) // m) * m


def _round_down(x: int, m: int) -> int:
    return (x // m) * m


def _pick_block_rows(rows: int) -> int:
    """Fixed large tile: multiple of 32, capped so grid has >= MIN_GRID steps.

    `rows` is already a multiple of SUBLANES (the wrapper pads).  The result
    is either a multiple of ROW_ALIGN or equals `rows` (a full-extent block),
    so bf16 / int8 packed layouts stay dense in every case.
    """
    cand = min(TARGET_BLOCK_ROWS, _round_down(rows // MIN_GRID, ROW_ALIGN))
    if cand >= ROW_ALIGN:
        return cand
    # Tiny input (< MIN_GRID * ROW_ALIGN rows): one full-extent tile.
    return rows


def _make_focal_kernel(block_rows: int, total: int, needs_mask: bool):
    def kernel(logits_ref, label_ref, psum_ref):
        # Inputs arrive in their native dtype (bf16 / int8 welcome) and are
        # widened to f32 on the VPU here, keeping HBM traffic minimal.
        x = logits_ref[...].astype(jnp.float32)
        z = label_ref[...].astype(jnp.float32)
        is_pos = z == 1.0

        # One shared exp feeds both the sigmoid and the stable BCE log-term.
        e = jnp.exp(-jnp.abs(x))                    # EUP
        inv = pl.reciprocal(1.0 + e, approx=True)   # EUP vrcp (approx)
        probs = jnp.where(x >= 0.0, inv, e * inv)   # sigmoid(x)

        pt = jnp.where(is_pos, probs, 1.0 - probs)
        one_minus_pt = 1.0 - pt
        alpha_t = jnp.where(is_pos, jnp.float32(ALPHA), jnp.float32(1.0 - ALPHA))

        # Numerically stable BCEWithLogits (reduction='none'):
        #   ce = max(x, 0) - x*z + log1p(exp(-|x|))
        ce = jnp.maximum(x, 0.0) - x * z + jnp.log1p(e)

        # gamma == 2 -> explicit square (no pow -> exp/log path, no log(0)).
        loss = alpha_t * (one_minus_pt * one_minus_pt) * ce

        def _store(vals):
            # Sublane-axis reduce only -> (1, 128) lane-dense partial.
            psum_ref[...] = jnp.sum(vals, axis=0, keepdims=True)

        if needs_mask:
            last = pl.program_id(0) == pl.num_programs(0) - 1

            @pl.when(last)
            def _():
                # Mask padded / out-of-bounds elements in the final tile only.
                # A select (not a multiply) so garbage values in the OOB region
                # (even NaN/Inf) cannot leak into the sum.
                # NOTE: int32 flat index limits total to < 2^31 elements.
                row = jax.lax.broadcasted_iota(jnp.int32, (block_rows, LANES), 0)
                lane = jax.lax.broadcasted_iota(jnp.int32, (block_rows, LANES), 1)
                start = pl.program_id(0) * block_rows
                flat = (start + row) * LANES + lane
                _store(jnp.where(flat < total, loss, 0.0))

            @pl.when(jnp.logical_not(last))
            def _():
                _store(loss)
        else:
            _store(loss)

    return kernel


def focal_loss_v1(logits, label):
    """Mean-reduced focal loss matching FocalLossV1(alpha=0.25, gamma=2).

    `logits` / `label` may be any dtype (bf16 logits and int8/bool labels are
    cheapest on HBM); they are cast to f32 inside the kernel.
    """
    assert logits.shape == label.shape
    total = logits.size
    assert total > 0

    flat_logits = logits.reshape(-1)
    flat_label = label.reshape(-1)

    # Pad the flat length to a multiple of 8*128 so the 2-D view is always
    # (8,128)-tileable; padded elements are masked out inside the kernel.
    padded_total = _round_up(total, SUBLANES * LANES)
    if padded_total != total:
        # TODO(synk): this pad is an extra HBM pass; fold it into the producer
        # if non-1024-multiple sizes ever show up on the hot path.
        flat_logits = jnp.pad(flat_logits, (0, padded_total - total))
        flat_label = jnp.pad(flat_label, (0, padded_total - total))

    rows = padded_total // LANES           # multiple of 8 by construction
    block_rows = _pick_block_rows(rows)
    grid_n = pl.cdiv(rows, block_rows)
    needs_mask = (padded_total != total) or (rows % block_rows != 0)

    logits2d = flat_logits.reshape(rows, LANES)
    label2d = flat_label.reshape(rows, LANES)

    kernel = _make_focal_kernel(block_rows, total, needs_mask)

    partials = pl.pallas_call(
        kernel,
        out_shape=jax.ShapeDtypeStruct((grid_n, 1, LANES), jnp.float32),
        grid=(grid_n,),
        in_specs=[
            pl.BlockSpec((block_rows, LANES), lambda i: (i, 0)),
            pl.BlockSpec((block_rows, LANES), lambda i: (i, 0)),
        ],
        out_specs=pl.BlockSpec((None, 1, LANES), lambda i: (i, 0, 0)),
        compiler_params=pltpu.CompilerParams(
            dimension_semantics=("parallel",),  # megacore-shardable on v7x
            vmem_limit_bytes=32 * 1024 * 1024,
        ),
    )(logits2d, label2d)

    # Tiny final reduce over (grid_n, 1, 128) partials + mean divisor.
    # (f32 divisor is ~1e-7 relatively inexact for total > 2^24; negligible.)
    return jnp.sum(partials) / jnp.float32(total)


def _reference(logits, label):
    x = logits.astype(jnp.float32)
    z = label.astype(jnp.float32)
    probs = jax.nn.sigmoid(x)
    pt = jnp.where(z == 1.0, probs, 1.0 - probs)
    alpha_t = jnp.where(z == 1.0, ALPHA, 1.0 - ALPHA)
    ce = jnp.maximum(x, 0.0) - x * z + jnp.log1p(jnp.exp(-jnp.abs(x)))
    loss = alpha_t * jnp.power(1.0 - pt, GAMMA) * ce
    return loss.mean()


if __name__ == "__main__":
    key = jax.random.PRNGKey(0)
    k_logits, k_label = jax.random.split(key)

    B, C, H, W = 2, 4, 16, 16  # NCHW, 2048 elements = 16 rows x 128 lanes
    logits = jax.random.normal(k_logits, (B, C, H, W), dtype=jnp.float32)
    # Narrow label dtype end-to-end (int8, hard {0,1}); the kernel widens it.
    label = jax.random.bernoulli(k_label, p=0.3, shape=(B, C, H, W)).astype(
        jnp.int8
    )

    out = focal_loss_v1(logits, label)
    out = jax.block_until_ready(out)

    ref = _reference(logits, label)
    # Slightly relaxed tolerance: pl.reciprocal(approx=True) in the kernel.
    assert jnp.allclose(out, ref, rtol=1e-3, atol=1e-5), (out, ref)

    print("KERNEL_OK")
</pallas_src>

<mosaic_0001>
module attributes {stable_mosaic.version = 11 : i64} {
  func.func @kernel(%arg0: i32, %arg1: memref<16x128xf32, #tpu.memory_space<vmem>>, %arg2: memref<16x128xi8, #tpu.memory_space<vmem>>, %arg3: memref<1x1x128xf32, #tpu.memory_space<vmem>>) attributes {dimension_semantics = [#tpu.dimension_semantics<parallel>], iteration_bounds = array<i64: 1>, scalar_prefetch = 0 : i64, scratch_operands = 0 : i64, tpu.core_type = #tpu.core_type<tc>, window_params = [{transform_indices = @transform_0, window_bounds = array<i64: 16, 128>}, {transform_indices = @transform_1, window_bounds = array<i64: 16, 128>}, {transform_indices = @transform_2, window_bounds = array<i64: 1, 1, 128>}]} {
    %c0 = arith.constant 0 : index
    %c0_0 = arith.constant 0 : index
    %0 = vector.load %arg1[%c0, %c0_0] : memref<16x128xf32, #tpu.memory_space<vmem>>, vector<16x128xf32>
    %c0_1 = arith.constant 0 : index
    %c0_2 = arith.constant 0 : index
    %1 = vector.load %arg2[%c0_1, %c0_2] : memref<16x128xi8, #tpu.memory_space<vmem>>, vector<16x128xi8>
    %2 = arith.sitofp %1 : vector<16x128xi8> to vector<16x128xf32>
    %cst = arith.constant 1.000000e+00 : f32
    %3 = vector.broadcast %cst : f32 to vector<16x128xf32>
    %4 = arith.cmpf oeq, %2, %3 : vector<16x128xf32>
    %5 = math.absf %0 : vector<16x128xf32>
    %cst_3 = arith.constant 0.000000e+00 : f32
    %6 = vector.broadcast %cst_3 : f32 to vector<16x128xf32>
    %7 = arith.subf %6, %5 : vector<16x128xf32>
    %8 = math.exp %7 : vector<16x128xf32>
    %cst_4 = arith.constant 1.000000e+00 : f32
    %9 = vector.broadcast %cst_4 : f32 to vector<16x128xf32>
    %10 = arith.addf %9, %8 : vector<16x128xf32>
    %11 = tpu.reciprocal %10 {approx = true} : vector<16x128xf32> -> vector<16x128xf32>
    %cst_5 = arith.constant 0.000000e+00 : f32
    %12 = vector.broadcast %cst_5 : f32 to vector<16x128xf32>
    %13 = arith.cmpf oge, %0, %12 : vector<16x128xf32>
    %14 = arith.mulf %8, %11 : vector<16x128xf32>
    %15 = arith.select %13, %11, %14 : vector<16x128xi1>, vector<16x128xf32>
    %cst_6 = arith.constant 1.000000e+00 : f32
    %16 = vector.broadcast %cst_6 : f32 to vector<16x128xf32>
    %17 = arith.subf %16, %15 : vector<16x128xf32>
    %18 = arith.select %4, %15, %17 : vector<16x128xi1>, vector<16x128xf32>
    %cst_7 = arith.constant 1.000000e+00 : f32
    %19 = vector.broadcast %cst_7 : f32 to vector<16x128xf32>
    %20 = arith.subf %19, %18 : vector<16x128xf32>
    %cst_8 = arith.constant 2.500000e-01 : f32
    %cst_9 = arith.constant 7.500000e-01 : f32
    %21 = vector.broadcast %cst_8 : f32 to vector<16x128xf32>
    %22 = vector.broadcast %cst_9 : f32 to vector<16x128xf32>
    %23 = arith.select %4, %21, %22 : vector<16x128xi1>, vector<16x128xf32>
    %cst_10 = arith.constant 0.000000e+00 : f32
    %24 = vector.broadcast %cst_10 : f32 to vector<16x128xf32>
    %25 = arith.maximumf %0, %24 : vector<16x128xf32>
    %26 = arith.mulf %0, %2 : vector<16x128xf32>
    %27 = arith.subf %25, %26 : vector<16x128xf32>
    %28 = math.log1p %8 : vector<16x128xf32>
    %29 = arith.addf %27, %28 : vector<16x128xf32>
    %30 = arith.mulf %20, %20 : vector<16x128xf32>
    %31 = arith.mulf %23, %30 : vector<16x128xf32>
    %32 = arith.mulf %31, %29 : vector<16x128xf32>
    %cst_11 = arith.constant dense<0.000000e+00> : vector<128xf32>
    %33 = vector.multi_reduction <add>, %32, %cst_11 [0] : vector<16x128xf32> to vector<128xf32>
    %34 = vector.shape_cast %33 : vector<128xf32> to vector<1x128xf32>
    %c0_12 = arith.constant 0 : index
    %c0_13 = arith.constant 0 : index
    %c0_14 = arith.constant 0 : index
    %35 = vector.load %arg3[%c0_12, %c0_13, %c0_14] : memref<1x1x128xf32, #tpu.memory_space<vmem>>, vector<1x1x128xf32>
    %36 = vector.shape_cast %35 : vector<1x1x128xf32> to vector<1x128xf32>
    %37 = vector.shape_cast %34 : vector<1x128xf32> to vector<1x1x128xf32>
    tpu.vector_store %arg3[%c0_12, %c0_13, %c0_14], %37 {strides = array<i32>} : memref<1x1x128xf32, #tpu.memory_space<vmem>>, vector<1x1x128xf32>,
    return
  }
  func.func @transform_0(%arg0: i32) -> (i32, i32) {
    %c0_i32 = arith.constant 0 : i32
    %c0_i32_0 = arith.constant 0 : i32
    return %arg0, %c0_i32 : i32, i32
  }
  func.func @transform_1(%arg0: i32) -> (i32, i32) {
    %c0_i32 = arith.constant 0 : i32
    %c0_i32_0 = arith.constant 0 : i32
    return %arg0, %c0_i32 : i32, i32
  }
  func.func @transform_2(%arg0: i32) -> (i32, i32, i32) {
    %c0_i32 = arith.constant 0 : i32
    %c0_i32_0 = arith.constant 0 : i32
    %c0_i32_1 = arith.constant 0 : i32
    return %arg0, %c0_i32, %c0_i32_0 : i32, i32, i32
  }
}

</mosaic_0001>

<bundles_post_ra>
// kernel: tpu_custom_call.1
= control target key start
LH: loop header
LB: loop body
LE: loop exit
PB: predicated region body
PF: predicated region fallthrough
CT: control target
= control target key end

     0   :  { %7 = vsyncpa [#allocation3], 0  ;;  %s298_s0 = inlined_call_operand.hbm [shape: f32[16,128], index: 0, kind: input, shape index: {}]   ;;  %s299_s1 = inlined_call_operand.hbm [shape: s8[16,128], index: 1, kind: input, shape index: {}]   ;;  %s300_s2 = inlined_call_operand.hbm [shape: f32[1,1,128], index: 2, kind: output, shape index: {}]  }
   0x1   :  { %8 = vsyncpa [#allocation6], 0 }
   0x2   :  { %9 = vsyncpa [#allocation4], 0  ;;  %s228_s9 = smov [#allocation2]   ;;  %s156_s13 = scalar_lea.hbm %s298_s0, 256 }
   0x3   :  { %s15_s10 = sshll.u32 %s228_s9, 4  ;;  %p157_p0 = scmp.ne.s32.totalorder %s298_s0, %s156_s13  ;;  %s16_s10 = int_to_ptr.vmem [resolvable:$true] %s15_s10 }
   0x4   :  { %p160_p1 = scmp.lt.u32.totalorder %s156_s13, %s298_s0 }
   0x6   :  { %p162_p2 = pnand %p160_p1, %p157_p0 }
   0x8   :  { %165 = shalt.err (!%p162_p2)
}
   0x9   :  { %s166_s18 = scalar_lea.vmem %s16_s10, 256  ;;  %p171_p4 = scmp.lt.s32.totalorder %s16_s10, %s16_s10 }
   0xa   :  { %p167_p3 = scmp.ne.s32.totalorder %s16_s10, %s166_s18  ;;  %p172_p5 = scmp.lt.s32.totalorder %s166_s18, %s166_s18 }
   0xc   :  { %p173_p6 = por %p172_p5, %p171_p4 }
   0xe   :  { %p174_p7 = pnand %p173_p6, %p167_p3 }
  0x10   :  { %177 = shalt.err (!%p174_p7)
}
  0x11   :  { %s229_s19 = smov 128   ;;  %s230_s20 = smov 8  }
  0x12   :  { %21 = dma.hbm_to_vmem [thread:$0]  %s298_s0, 256, %s16_s10, [#allocation3], %s229_s19, %s229_s19, %s230_s20  }
  0x13   :  { %s231_s23 = smov [#allocation5]   ;;  %s178_s27 = scalar_lea.hbm %s299_s1, 64 }
  0x14   :  { %s27_s24 = sshll.u32 %s231_s23, 4  ;;  %p179_p8 = scmp.ne.s32.totalorder %s299_s1, %s178_s27  ;;  %s28_s24 = int_to_ptr.vmem [resolvable:$true] %s27_s24 }
  0x15   :  { %p182_p9 = scmp.lt.u32.totalorder %s178_s27, %s299_s1 }
  0x17   :  { %p184_p10 = pnand %p182_p9, %p179_p8 }
  0x19   :  { %187 = shalt.err (!%p184_p10)
}
  0x1a   :  { %s188_s4 = scalar_lea.vmem %s28_s24, 64  ;;  %p193_p12 = scmp.lt.s32.totalorder %s28_s24, %s28_s24 }
  0x1b   :  { %p189_p11 = scmp.ne.s32.totalorder %s28_s24, %s188_s4  ;;  %p194_p13 = scmp.lt.s32.totalorder %s188_s4, %s188_s4 }
  0x1d   :  { %p195_p0 = por %p194_p13, %p193_p12 }
  0x1f   :  { %p196_p1 = pnand %p195_p0, %p189_p11 }
  0x21   :  { %199 = shalt.err (!%p196_p1)
}
  0x22   :  { %s232_s0 = smov 32   ;;  %s233_s5 = smov 2  }
  0x23   :  { %33 = dma.hbm_to_vmem [thread:$0]  %s299_s1, 64, %s28_s24, [#allocation6], %s232_s0, %s232_s0, %s233_s5  }
  0x24   :  { %222 = dma.done.wait [#allocation3], 256  }
  0x25   :  { %223 = vsyncadd [#allocation3], 4294967040 }
  0x26   :  { %224 = dma.done.wait [#allocation6], 64  }
  0x27   :  { %225 = vsyncadd [#allocation6], 4294967232  ;;  %v40_v0 = vld [vmem:[#allocation2] sm:$0xff]  ;;  %v41_v1 = vld [vmem:[#allocation2 + $0x8] sm:$0xff]  ;;  %v234_v50 = vmov 0.75   ;;  %s235_s1 = smov [#allocation7]  }
  0x28   :  { %v50_v2 = vand.u32 2147483647, %v40_v0  ;;  %v51_v3 = vand.u32 2147483647, %v41_v1  ;;  %v133_v12 = vld [vmem:[#allocation5] sm:$0xf]  }
  0x29   :  { %v134_v13 = vunpack.c.0.s8 %v133_v12  ;;  %v135_v14 = vunpack.c.1.s8 %v133_v12  ;;  %vm62_vm0 = vcmp.ge.f32.partialorder %v40_v0, 0.0  ;;  %vm63_vm1 = vcmp.ge.f32.partialorder %v41_v1, 0.0  ;;  %s122_s8 = sshll.u32 %s235_s1, 4  ;;  %s123_s8 = int_to_ptr.vmem [resolvable:$true] %s122_s8 }
  0x2a   :  { %v52_v4 = vsub.f32 0.0, %v50_v2  ;;  %v53_v5 = vsub.f32 0.0, %v51_v3  ;;  %v76_v23 = vmax.f32 %v40_v0, 0.0  ;;  %v77_v27 = vmax.f32 %v41_v1, 0.0  ;;  %s200_s9 = scalar_lea.vmem %s123_s8, 16  ;;  %s204_s10 = scalar_lea.vmem %s123_s8, 32 }
  0x2b   :  { %v46_v17 = vcvt.s32.f32 %v134_v13  ;;  %v47_v18 = vcvt.s32.f32 %v135_v14  ;;  %p201_p2 = scmp.ne.s32.totalorder %s123_s8, %s200_s9  ;;  %p205_p3 = scmp.lt.s32.totalorder %s123_s8, %s123_s8 }
  0x2c   :  { %v54_v6 = vmul.f32 1.442695, %v52_v4  ;;  %v56_v7 = vmul.f32 1.442695, %v53_v5  ;;  %p206_p4 = scmp.lt.s32.totalorder %s204_s10, %s200_s9 }
  0x2d   :  { %vm48_vm2 = vcmp.eq.f32.partialorder %v46_v17, 1.0  ;;  %v78_v28 = vmul.f32 %v46_v17, %v40_v0  ;;  %vm49_vm3 = vcmp.eq.f32.partialorder %v47_v18, 1.0  ;;  %v79_v31 = vmul.f32 %v47_v18, %v41_v1 }
  0x2e   :  { %144 = vpow2.f32 %v54_v6  ;;  %v74_v51 = vsel %vm48_vm2, 0.25, %v234_v50  ;;  %v75_v52 = vsel %vm49_vm3, 0.25, %v234_v50  ;;  %p207_p5 = por %p206_p4, %p205_p3 }
  0x2f   :  { %146 = vpow2.f32 %v56_v7  ;;  %v80_v42 = vsub.f32 %v76_v23, %v78_v28  ;;  %v81_v44 = vsub.f32 %v77_v27, %v79_v31 }
  0x30   :  { %p208_p6 = pnand %p207_p5, %p201_p2 }
  0x38   :  { %v145_v8 = vpop.eup %144 }
  0x39   :  { %v147_v9 = vpop.eup %146  ;;  %v58_v10 = vadd.f32 1.0, %v145_v8  ;;  %v85_v15 = vmul.f32 -0.5, %v145_v8  ;;  %v88_v20 = vand.u32 2147483647, %v145_v8 }
  0x3a   :  { %v59_v11 = vadd.f32 1.0, %v147_v9  ;;  %v94_v16 = vmul.f32 -0.5, %v147_v9  ;;  %v97_v24 = vand.u32 2147483647, %v147_v9 }
  0x3b   :  { %148 = vrcp.f32 %v58_v10  ;;  %v86_v19 = vadd.f32 1.0, %v85_v15  ;;  %vm275_vm4 = vcmp.lt.f32.partialorder %v88_v20, 0.0004427343 }
  0x3c   :  { %150 = vrcp.f32 %v59_v11  ;;  %v95_v21 = vadd.f32 1.0, %v94_v16  ;;  %vm98_vm5 = vcmp.lt.f32.partialorder %v97_v24, 0.0004427343 }
  0x3d   :  { %152 = vlog2.f32 %v58_v10  ;;  %v87_v32 = vmul.f32 %v145_v8, %v86_v19 }
  0x3e   :  { %154 = vlog2.f32 %v59_v11  ;;  %v96_v37 = vmul.f32 %v147_v9, %v95_v21 }
  0x45   :  { %v149_v22 = vpop.eup %148 }
  0x46   :  { %v151_v25 = vpop.eup %150  ;;  %v64_v26 = vmul.f32 %v149_v22, %v145_v8 }
  0x47   :  { %v153_v29 = vpop.eup %152  ;;  %v65_v30 = vmul.f32 %v151_v25, %v147_v9 }
  0x48   :  { %v155_v33 = vpop.eup %154  ;;  %v66_v34 = vsel %vm62_vm0, %v149_v22, %v64_v26  ;;  %v84_v35 = vmul.f32 0.6931472, %v153_v29 }
  0x49   :  { %v67_v38 = vsel %vm63_vm1, %v151_v25, %v65_v30  ;;  %v68_v39 = vsub.f32 1.0, %v66_v34  ;;  %v93_v40 = vmul.f32 0.6931472, %v155_v33 }
  0x4a   :  { %v69_v41 = vsub.f32 1.0, %v67_v38  ;;  %v90_v45 = vsel %vm275_vm4, %v87_v32, %v84_v35 }
  0x4b   :  { %v70_v43 = vsel %vm48_vm2, %v66_v34, %v68_v39  ;;  %v99_v48 = vsel %vm98_vm5, %v96_v37, %v93_v40  ;;  %v100_v53 = vadd.f32 %v90_v45, %v80_v42 }
  0x4c   :  { %v71_v46 = vsel %vm49_vm3, %v67_v38, %v69_v41  ;;  %v72_v47 = vsub.f32 1.0, %v70_v43  ;;  %v101_v55 = vadd.f32 %v99_v48, %v81_v44 }
  0x4d   :  { %v73_v49 = vsub.f32 1.0, %v71_v46 }
  0x4e   :  { %v102_v54 = vmul.f32 %v72_v47, %v72_v47 }
  0x4f   :  { %v103_v56 = vmul.f32 %v73_v49, %v73_v49 }
  0x50   :  { %v104_v57 = vmul.f32 %v102_v54, %v74_v51 }
  0x51   :  { %v105_v58 = vmul.f32 %v103_v56, %v75_v52 }
  0x52   :  { %v106_v59 = vmul.f32 %v104_v57, %v100_v53 }
  0x53   :  { %v107_v60 = vmul.f32 %v105_v58, %v101_v55 }
  0x55   :  { %v108_v61 = vadd.f32 %v107_v60, %v106_v59 }
  0x57   :  { %v109_v62 = vrot.slane %v108_v61, 4 }
  0x59   :  { %v110_v63 = vadd.f32 %v109_v62, %v108_v61 }
  0x5b   :  { %v111_v0 = vrot.slane %v110_v63, 2 }
  0x5d   :  { %v112_v1 = vadd.f32 %v111_v0, %v110_v63 }
  0x5f   :  { %v113_v2 = vrot.slane %v112_v1, 1 }
  0x61   :  { %v114_v3 = vadd.f32 %v113_v2, %v112_v1 }
  0x63   :  { %115 = vst [vmem:[#allocation7] sm:$0x1] %v114_v3 }
  0x64   :  { %211 = shalt.err (!%p208_p6)
}
  0x65   :  { %s212_s13 = scalar_lea.hbm %s300_s2, 16 }
  0x66   :  { %p213_p7 = scmp.ne.s32.totalorder %s300_s2, %s212_s13  ;;  %p216_p8 = scmp.lt.u32.totalorder %s212_s13, %s300_s2 }
  0x68   :  { %p218_p9 = pnand %p216_p8, %p213_p7 }
  0x6a   :  { %221 = shalt.err (!%p218_p9)
}
  0x6b   :  { %125 = dma.vmem_to_hbm [thread:$0]  %s123_s8, 16, %s300_s2, [#allocation4]  }
  0x6c   :  { %226 = dma.done.wait [#allocation4], 16  }
  0x6d   :  { %227 = vsyncadd [#allocation4], 4294967280 }
  0x6e   :  { %129 = vsyncpa [#allocation3], 1 }
  0x6f   :  { %130 = vsyncpa [#allocation6], 1 }
  0x70   :  { %131 = vsyncpa [#allocation4], 1 }

</bundles_post_ra>
